<compile_context>
chip_gen: v5e
topology: v5e:2x2
jax: 0.10.0
libtpu: 0.0.40
codegen_flags: <defaults>
</compile_context>

<pallas_src>
import jax
import jax.numpy as jnp
from jax.experimental import pallas as pl
from jax.experimental.pallas import tpu as pltpu


_INV_SQRT2 = 0.7071067811865475
_MIB = 1024 * 1024


def _round_up(x, m):
    return ((x + m - 1) // m) * m


# ----------------------------------------------------------------------------
# Kernels
# ----------------------------------------------------------------------------

def _dense_gelu_acc_kernel(x_ref, w_ref, b_ref, o_ref, acc_ref):
    """3-D grid (i, j, k): K-reduction with a resident f32 accumulator."""
    k = pl.program_id(2)

    @pl.when(k == 0)
    def _():
        acc_ref[...] = jnp.zeros_like(acc_ref)

    acc_ref[...] += jnp.dot(x_ref[...], w_ref[...],
                            preferred_element_type=jnp.float32)

    # Epilogue (bias + exact GELU) only once per output tile, on the last K step.
    @pl.when(k == pl.num_programs(2) - 1)
    def _():
        y = acc_ref[...] + b_ref[...].astype(jnp.float32)
        out = 0.5 * y * (1.0 + jax.lax.erf(y * _INV_SQRT2))
        o_ref[...] = out.astype(o_ref.dtype)


def _dense_gelu_kernel(x_ref, w_ref, b_ref, o_ref):
    """2-D grid (i, j): the whole K dimension fits one block -> no accumulator."""
    y = jnp.dot(x_ref[...], w_ref[...], preferred_element_type=jnp.float32)
    y = y + b_ref[...].astype(jnp.float32)
    o_ref[...] = (0.5 * y * (1.0 + jax.lax.erf(y * _INV_SQRT2))).astype(o_ref.dtype)


# ----------------------------------------------------------------------------
# Tile selection
# ----------------------------------------------------------------------------

def _choose_tile(dim, target, align):
    """Pick a tile <= target (multiple of `align`) for a dim that is already a
    multiple of `align`.  Prefer large tiles, but never pay more than ~10%
    padding waste over the best available candidate."""
    if dim <= target:
        return dim
    candidates = set()
    for num in range(8, 0, -1):                       # 8/8, 7/8, ..., 1/8 of target
        c = (target * num // 8) // align * align
        if c >= align:
            candidates.add(c)
    d = (target // align) * align                     # largest exact divisor, if any
    while d >= align:
        if dim % d == 0:
            candidates.add(d)
            break
        d -= align
    padded = {c: _round_up(dim, c) for c in candidates}
    min_pad = min(padded.values())
    ok = [c for c, p in padded.items() if p <= min_pad * 1.1 + align]
    return max(ok)


def _pick_tiles(Ma, Ha, Ia, in_dtype):
    """Per-generation + per-dtype tile targets and VMEM cap."""
    try:
        vmem_cap = pltpu.get_tpu_info().vmem_capacity_bytes
    except Exception:
        vmem_cap = 64 * _MIB                          # conservative (v7x-sized)
    big_vmem = vmem_cap >= 96 * _MIB                  # v5e / v6e: 128 MiB VMEM
    narrow = jnp.dtype(in_dtype).itemsize < 4

    if narrow:                                        # bf16 / fp8: HBM-bound unless tiles grow
        tm_t, tn_t = 1024, 1024
    else:                                             # f32: 512 tiles are already MXU-bound
        tm_t, tn_t = 512, 512
    tk_t = 2048 if big_vmem else 1024                 # collapse K whenever it fits

    tm = _choose_tile(Ma, tm_t, 8)
    tn = _choose_tile(Ia, tn_t, 128)                  # keep output lane-dense (x128)
    tk = _choose_tile(Ha, tk_t, 128)
    cap = (96 if big_vmem else 48) * _MIB             # <= 75% of physical on every gen
    return tm, tn, tk, cap


# ----------------------------------------------------------------------------
# Wrapper
# ----------------------------------------------------------------------------

def iqm_intermediate(hidden_states, weight, bias):
    """hidden_states: [B, S, H], weight: [H, I], bias: [I] -> [B, S, I]."""
    B, S, H = hidden_states.shape
    I = weight.shape[1]
    M = B * S
    out_dtype = hidden_states.dtype

    # Minimal hardware alignment only (8 sublanes / 128 lanes).
    Ma, Ha, Ia = _round_up(M, 8), _round_up(H, 128), _round_up(I, 128)

    tm, tn, tk, vmem_cap = _pick_tiles(Ma, Ha, Ia, hidden_states.dtype)

    # Tiles were chosen to keep this padding minimal; padded K columns are zero
    # (contribute nothing), padded M rows / N columns are sliced off below.
    Mp, Hp, Ip = _round_up(Ma, tm), _round_up(Ha, tk), _round_up(Ia, tn)

    x2d = hidden_states.reshape(M, H)
    if (Mp, Hp) != (M, H):
        x2d = jnp.pad(x2d, ((0, Mp - M), (0, Hp - H)))
    w2d = weight
    if (Hp, Ip) != (H, I):
        w2d = jnp.pad(w2d, ((0, Hp - H), (0, Ip - I)))
    b2d = bias.reshape(1, I)
    if Ip != I:
        b2d = jnp.pad(b2d, ((0, 0), (0, Ip - I)))

    gm, gn, gk = Mp // tm, Ip // tn, Hp // tk

    in_itemsize = jnp.dtype(x2d.dtype).itemsize
    w_itemsize = jnp.dtype(w2d.dtype).itemsize
    out_itemsize = jnp.dtype(out_dtype).itemsize

    # x is re-streamed once per N tile, W once per M tile.
    cost = pl.CostEstimate(
        flops=2 * Mp * Hp * Ip,
        transcendentals=Mp * Ip,
        bytes_accessed=(gn * Mp * Hp * in_itemsize
                        + gm * Hp * Ip * w_itemsize
                        + Ip * w_itemsize
                        + Mp * Ip * out_itemsize),
    )

    # Prefer splitting the 2-TC megacore on M when the activation matrix is
    # much larger than the weight (only the small operand gets double-streamed).
    split_on_m_only = Mp * Hp >= 4 * Hp * Ip and gm > 1

    if gk == 1:
        kernel = _dense_gelu_kernel
        grid = (gm, gn)
        in_specs = [
            pl.BlockSpec((tm, tk), lambda i, j: (i, 0)),   # activations
            pl.BlockSpec((tk, tn), lambda i, j: (0, j)),   # weight tile
            pl.BlockSpec((1, tn), lambda i, j: (0, j)),    # bias tile
        ]
        out_specs = pl.BlockSpec((tm, tn), lambda i, j: (i, j))
        scratch = []
        dims = ("parallel", "arbitrary") if split_on_m_only else ("parallel", "parallel")
    else:
        kernel = _dense_gelu_acc_kernel
        grid = (gm, gn, gk)
        in_specs = [
            pl.BlockSpec((tm, tk), lambda i, j, k: (i, k)),   # activations
            pl.BlockSpec((tk, tn), lambda i, j, k: (k, j)),   # weight tile
            pl.BlockSpec((1, tn), lambda i, j, k: (0, j)),    # bias tile
        ]
        out_specs = pl.BlockSpec((tm, tn), lambda i, j, k: (i, j))
        scratch = [pltpu.VMEM((tm, tn), jnp.float32)]
        dims = (("parallel", "arbitrary", "arbitrary") if split_on_m_only
                else ("parallel", "parallel", "arbitrary"))

    # Double-buffered input/output tiles + f32 accumulator + headroom,
    # clamped to what this generation's scoped VMEM can hold.
    vmem_need = (2 * (tm * tk * in_itemsize + tk * tn * w_itemsize + tn * w_itemsize)
                 + 2 * tm * tn * out_itemsize
                 + (tm * tn * 4 if gk > 1 else 0))
    vmem_limit = int(min(vmem_cap, max(vmem_need + 16 * _MIB, 32 * _MIB)))

    out2d = pl.pallas_call(
        kernel,
        out_shape=jax.ShapeDtypeStruct((Mp, Ip), out_dtype),
        grid_spec=pltpu.PrefetchScalarGridSpec(
            num_scalar_prefetch=0,
            grid=grid,
            in_specs=in_specs,
            out_specs=out_specs,
            scratch_shapes=scratch,
        ),
        compiler_params=pltpu.CompilerParams(
            dimension_semantics=dims,
            vmem_limit_bytes=vmem_limit,
        ),
        cost_estimate=cost,
    )(x2d, w2d, b2d)

    return out2d[:M, :I].reshape(B, S, I)


def reference(hidden_states, weight, bias):
    y = jnp.einsum("bsh,hi->bsi", hidden_states, weight) + bias
    return jax.nn.gelu(y, approximate=False)


if __name__ == "__main__":
    # Small shapes consistent with the module: batch=2, seq=8, hidden=32,
    # intermediate=64 (intermediate_size = 2 * hidden_size here).
    B, S, H, I = 2, 8, 32, 64

    key = jax.random.PRNGKey(0)
    kx, kw, kb = jax.random.split(key, 3)

    hidden_states = jax.random.normal(kx, (B, S, H), dtype=jnp.float32)
    # Deterministic "Linear" params (synthetic, not a checkpoint load); weight
    # is stored as [H, I] == transpose of PyTorch's nn.Linear [I, H].
    weight = jax.random.normal(kw, (H, I), dtype=jnp.float32) * (1.0 / H ** 0.5)
    bias = jax.random.normal(kb, (I,), dtype=jnp.float32) * 0.02

    out = iqm_intermediate(hidden_states, weight, bias)
    out = jax.block_until_ready(out)

    ref = reference(hidden_states, weight, bias)
    assert out.shape == (B, S, I)
    assert jnp.allclose(out, ref, atol=2e-5, rtol=2e-5), "mismatch vs reference"

    print("KERNEL_OK")
</pallas_src>

<mosaic_0001>
module attributes {stable_mosaic.version = 11 : i64} {
  func.func @_dense_gelu_kernel(%arg0: i32, %arg1: i32, %arg2: memref<16x128xf32, #tpu.memory_space<vmem>>, %arg3: memref<128x128xf32, #tpu.memory_space<vmem>>, %arg4: memref<1x128xf32, #tpu.memory_space<vmem>>, %arg5: memref<16x128xf32, #tpu.memory_space<vmem>>) attributes {dimension_semantics = [#tpu.dimension_semantics<parallel>, #tpu.dimension_semantics<parallel>], iteration_bounds = array<i64: 1, 1>, scalar_prefetch = 0 : i64, scratch_operands = 0 : i64, tpu.core_type = #tpu.core_type<tc>, window_params = [{transform_indices = @transform_0, window_bounds = array<i64: 16, 128>}, {transform_indices = @transform_1, window_bounds = array<i64: 128, 128>}, {transform_indices = @transform_2, window_bounds = array<i64: 1, 128>}, {transform_indices = @transform_3, window_bounds = array<i64: 16, 128>}]} {
    %c0 = arith.constant 0 : index
    %c0_0 = arith.constant 0 : index
    %0 = vector.load %arg2[%c0, %c0_0] : memref<16x128xf32, #tpu.memory_space<vmem>>, vector<16x128xf32>
    %c0_1 = arith.constant 0 : index
    %c0_2 = arith.constant 0 : index
    %1 = vector.load %arg3[%c0_1, %c0_2] : memref<128x128xf32, #tpu.memory_space<vmem>>, vector<128x128xf32>
    %cst = arith.constant dense<0.000000e+00> : vector<16x128xf32>
    %2 = tpu.matmul %0, %1, %cst {dimension_numbers = #tpu.dot_dimension_numbers<[1], [0], [0], [1], [0, 0, 1, 1], [], []>} : vector<16x128xf32>, vector<128x128xf32>, vector<16x128xf32> -> vector<16x128xf32>
    %c0_3 = arith.constant 0 : index
    %c0_4 = arith.constant 0 : index
    %3 = vector.load %arg4[%c0_3, %c0_4] : memref<1x128xf32, #tpu.memory_space<vmem>>, vector<1x128xf32>
    %4 = vector.broadcast %3 : vector<1x128xf32> to vector<16x128xf32>
    %5 = arith.addf %2, %4 : vector<16x128xf32>
    %cst_5 = arith.constant 5.000000e-01 : f32
    %6 = vector.broadcast %cst_5 : f32 to vector<16x128xf32>
    %7 = arith.mulf %6, %5 : vector<16x128xf32>
    %cst_6 = arith.constant 0.707106769 : f32
    %8 = vector.broadcast %cst_6 : f32 to vector<16x128xf32>
    %9 = arith.mulf %5, %8 : vector<16x128xf32>
    %10 = math.erf %9 : vector<16x128xf32>
    %cst_7 = arith.constant 1.000000e+00 : f32
    %11 = vector.broadcast %cst_7 : f32 to vector<16x128xf32>
    %12 = arith.addf %11, %10 : vector<16x128xf32>
    %13 = arith.mulf %7, %12 : vector<16x128xf32>
    %c0_8 = arith.constant 0 : index
    %c0_9 = arith.constant 0 : index
    %14 = vector.load %arg5[%c0_8, %c0_9] : memref<16x128xf32, #tpu.memory_space<vmem>>, vector<16x128xf32>
    tpu.vector_store %arg5[%c0_8, %c0_9], %13 {strides = array<i32>} : memref<16x128xf32, #tpu.memory_space<vmem>>, vector<16x128xf32>,
    return
  }
  func.func @transform_0(%arg0: i32, %arg1: i32) -> (i32, i32) {
    %c0_i32 = arith.constant 0 : i32
    %c0_i32_0 = arith.constant 0 : i32
    return %arg0, %c0_i32 : i32, i32
  }
  func.func @transform_1(%arg0: i32, %arg1: i32) -> (i32, i32) {
    %c0_i32 = arith.constant 0 : i32
    %c0_i32_0 = arith.constant 0 : i32
    return %c0_i32, %arg1 : i32, i32
  }
  func.func @transform_2(%arg0: i32, %arg1: i32) -> (i32, i32) {
    %c0_i32 = arith.constant 0 : i32
    %c0_i32_0 = arith.constant 0 : i32
    return %c0_i32, %arg1 : i32, i32
  }
  func.func @transform_3(%arg0: i32, %arg1: i32) -> (i32, i32) {
    %c0_i32 = arith.constant 0 : i32
    return %arg0, %arg1 : i32, i32
  }
}

</mosaic_0001>

<bundles_post_ra>
// kernel: tpu_custom_call.1
= control target key start
LH: loop header
LB: loop body
LE: loop exit
PB: predicated region body
PF: predicated region fallthrough
CT: control target
= control target key end

     0   :  { %8 = vsyncpa [#allocation3], 0  ;;  %s372_s0 = inlined_call_operand.hbm [shape: f32[16,128], index: 0, kind: input, shape index: {}]   ;;  %s373_s1 = inlined_call_operand.hbm [shape: f32[128,128], index: 1, kind: input, shape index: {}]   ;;  %s374_s2 = inlined_call_operand.vmem [shape: f32[1,128], index: 2, kind: input, shape index: {}]   ;;  %s375_s3 = inlined_call_operand.hbm [shape: f32[16,128], index: 3, kind: output, shape index: {}]  }
   0x1   :  { %9 = vsyncpa [#allocation6], 0 }
   0x2   :  { %10 = vsyncpa [#allocation4], 0  ;;  %s15_s14 = sshll.u32 %s372_s0, 4  ;;  %s308_s15 = smov [#allocation2]   ;;  %s16_s14 = int_to_ptr.hbm [resolvable:$true] %s15_s14 }
   0x3   :  { %s17_s16 = sshll.u32 %s308_s15, 4  ;;  %s28_s19 = sshll.u32 %s373_s1, 4  ;;  %s18_s16 = int_to_ptr.vmem [resolvable:$true] %s17_s16  ;;  %s29_s19 = int_to_ptr.hbm [resolvable:$true] %s28_s19 }
   0x4   :  { %s309_s20 = smov 128   ;;  %s310_s21 = smov 8  }
   0x5   :  { %23 = dma.hbm_to_vmem [thread:$0]  %s16_s14, 256, %s18_s16, [#allocation3], %s309_s20, %s309_s20, %s310_s21  }
   0x6   :  { %s311_s22 = smov [#allocation5]  }
   0x7   :  { %s30_s23 = sshll.u32 %s311_s22, 4  ;;  %s31_s23 = int_to_ptr.vmem [resolvable:$true] %s30_s23 }
   0x8   :  { %36 = dma.hbm_to_vmem [thread:$0]  %s29_s19, 2048, %s31_s23, [#allocation6], %s309_s20, %s309_s20, %s310_s21  }
   0x9   :  { %302 = dma.done.wait [#allocation3], 256  }
   0xa   :  { %303 = vsyncadd [#allocation3], 4294967040 }
   0xb   :  { %304 = dma.done.wait [#allocation6], 2048  }
   0xc   :  { %305 = vsyncadd [#allocation6], 4294965248  ;;  %v64_v0 = vld [vmem:[#allocation5 + $0x78] sm:$0xff]  ;;  %v63_v1 = vld [vmem:[#allocation5 + $0x70] sm:$0xff]  ;;  %s188_s27 = sshll.u32 %s375_s3, 4  ;;  %s189_s27 = int_to_ptr.hbm [resolvable:$true] %s188_s27 }
   0xd   :  { %69 = vmatpush.msra.mxu0 %v64_v0  ;;  %204 = vmatpush.msra.mxu1 %v64_v0  ;;  %v62_v2 = vld [vmem:[#allocation5 + $0x68] sm:$0xff]  ;;  %v61_v3 = vld [vmem:[#allocation5 + $0x60] sm:$0xff]  ;;  %v60_v4 = vld [vmem:[#allocation5 + $0x58] sm:$0xff] }
   0xe   :  { %v59_v5 = vld [vmem:[#allocation5 + $0x50] sm:$0xff]  ;;  %v58_v6 = vld [vmem:[#allocation5 + $0x48] sm:$0xff]  ;;  %v57_v7 = vld [vmem:[#allocation5 + $0x40] sm:$0xff] }
   0xf   :  { %70 = vmatpush.msra.mxu0 %v63_v1  ;;  %205 = vmatpush.msra.mxu1 %v63_v1  ;;  %v56_v8 = vld [vmem:[#allocation5 + $0x38] sm:$0xff]  ;;  %v55_v9 = vld [vmem:[#allocation5 + $0x30] sm:$0xff]  ;;  %v54_v10 = vld [vmem:[#allocation5 + $0x28] sm:$0xff] }
  0x10   :  { %v53_v11 = vld [vmem:[#allocation5 + $0x20] sm:$0xff]  ;;  %v52_v12 = vld [vmem:[#allocation5 + $0x18] sm:$0xff]  ;;  %v51_v13 = vld [vmem:[#allocation5 + $0x10] sm:$0xff] }
  0x11   :  { %71 = vmatpush.msra.mxu0 %v62_v2  ;;  %206 = vmatpush.msra.mxu1 %v62_v2  ;;  %v50_v14 = vld [vmem:[#allocation5 + $0x8] sm:$0xff]  ;;  %v49_v15 = vld [vmem:[#allocation5] sm:$0xff]  ;;  %v47_v16 = vld [vmem:[#allocation2] sm:$0xff] }
  0x12   :  { %v48_v17 = vld [vmem:[#allocation2 + $0x8] sm:$0xff]  ;;  %v225_v18 = vld [vmem:[%s374_s2] ss:$0 sm:$0xff]  ;;  %s312_s2 = smov [#allocation7]  }
  0x13   :  { %72 = vmatpush.msra.mxu0 %v61_v3  ;;  %207 = vmatpush.msra.mxu1 %v61_v3  ;;  %s186_s24 = sshll.u32 %s312_s2, 4  ;;  %s187_s24 = int_to_ptr.vmem [resolvable:$true] %s186_s24 }
  0x15   :  { %73 = vmatpush.msra.mxu0 %v60_v4  ;;  %208 = vmatpush.msra.mxu1 %v60_v4 }
  0x17   :  { %74 = vmatpush.msra.mxu0 %v59_v5  ;;  %209 = vmatpush.msra.mxu1 %v59_v5 }
  0x19   :  { %75 = vmatpush.msra.mxu0 %v58_v6  ;;  %210 = vmatpush.msra.mxu1 %v58_v6 }
  0x1b   :  { %76 = vmatpush.msra.mxu0 %v57_v7  ;;  %211 = vmatpush.msra.mxu1 %v57_v7 }
  0x1d   :  { %77 = vmatpush.msra.mxu0 %v56_v8  ;;  %212 = vmatpush.msra.mxu1 %v56_v8 }
  0x1f   :  { %78 = vmatpush.msra.mxu0 %v55_v9  ;;  %213 = vmatpush.msra.mxu1 %v55_v9 }
  0x21   :  { %79 = vmatpush.msra.mxu0 %v54_v10  ;;  %214 = vmatpush.msra.mxu1 %v54_v10 }
  0x23   :  { %80 = vmatpush.msra.mxu0 %v53_v11  ;;  %215 = vmatpush.msra.mxu1 %v53_v11 }
  0x25   :  { %81 = vmatpush.msra.mxu0 %v52_v12  ;;  %216 = vmatpush.msra.mxu1 %v52_v12 }
  0x27   :  { %82 = vmatpush.msra.mxu0 %v51_v13  ;;  %217 = vmatpush.msra.mxu1 %v51_v13 }
  0x29   :  { %83 = vmatpush.msra.mxu0 %v50_v14  ;;  %218 = vmatpush.msra.mxu1 %v50_v14 }
  0x2b   :  { %84 = vmatpush.msra.mxu0 %v49_v15  ;;  %219 = vmatpush.msra.mxu1 %v49_v15 }
  0x2c   :  { %85 = vmatmul.f32.vlgmr.msra.gmra.mxu0 %v47_v16  ;;  %88 = vmatmul.f32.vlgmr.msra.gmra.mxu1 %v48_v17 }
  0xa9   :  { %v86_v19 = vpop.f32.mrf.mxu0  ;;  %v89_v20 = vpop.f32.mrf.mxu1 }
  0xaa   :  { %v348_v21 = vadd.f32 %v225_v18, %v86_v19  ;;  %v350_v22 = vadd.f32 %v225_v18, %v89_v20 }
  0xac   :  { %v353_v23 = vmul.f32 0.70710677, %v348_v21  ;;  %v356_v24 = vmul.f32 0.70710677, %v350_v22 }
  0xae   :  { %v96_v25 = vmul.f32 %v353_v23, %v353_v23  ;;  %v136_v26 = vmul.f32 %v356_v24, %v356_v24 }
  0xb0   :  { %v97_v27 = vmin.f32 %v96_v25, 16.0  ;;  %v137_v28 = vmin.f32 %v136_v26, 16.0 }
  0xb2   :  { %v98_v29 = vmul.f32 2.1237322e-06, %v97_v27  ;;  %v109_v30 = vmul.f32 3.8918573e-05, %v97_v27  ;;  %v138_v31 = vmul.f32 2.1237322e-06, %v137_v28 }
  0xb3   :  { %v149_v32 = vmul.f32 3.8918573e-05, %v137_v28 }
  0xb4   :  { %v99_v33 = vadd.f32 0.00028619796, %v98_v29  ;;  %v110_v34 = vadd.f32 0.001143296, %v109_v30  ;;  %v139_v35 = vadd.f32 0.00028619796, %v138_v31 }
  0xb5   :  { %v150_v36 = vadd.f32 0.001143296, %v149_v32 }
  0xb6   :  { %v100_v37 = vmul.f32 %v99_v33, %v97_v27  ;;  %v111_v38 = vmul.f32 %v110_v34, %v97_v27  ;;  %v140_v39 = vmul.f32 %v139_v35, %v137_v28  ;;  %v92_v35 = vmul.f32 0.5, %v348_v21 }
  0xb7   :  { %v151_v40 = vmul.f32 %v150_v36, %v137_v28 }
  0xb8   :  { %v101_v41 = vadd.f32 0.0036580483, %v100_v37  ;;  %v112_v42 = vadd.f32 0.014752088, %v111_v38  ;;  %v141_v45 = vadd.f32 0.0036580483, %v140_v39 }
  0xb9   :  { %v152_v43 = vadd.f32 0.014752088, %v151_v40 }
  0xba   :  { %v113_v44 = vmul.f32 %v112_v42, %v97_v27  ;;  %v102_v47 = vmul.f32 %v101_v41, %v97_v27  ;;  %v142_v51 = vmul.f32 %v141_v45, %v137_v28 }
  0xbb   :  { %v153_v46 = vmul.f32 %v152_v43, %v137_v28 }
  0xbc   :  { %v114_v48 = vadd.f32 0.112945676, %v113_v44  ;;  %v103_v53 = vadd.f32 0.05243302, %v102_v47  ;;  %v143_v57 = vadd.f32 0.05243302, %v142_v51 }
  0xbd   :  { %v154_v49 = vadd.f32 0.112945676, %v153_v46 }
  0xbe   :  { %v115_v50 = vmul.f32 %v114_v48, %v97_v27  ;;  %v104_v59 = vmul.f32 %v103_v53, %v97_v27  ;;  %v144_v62 = vmul.f32 %v143_v57, %v137_v28 }
  0xbf   :  { %v155_v52 = vmul.f32 %v154_v49, %v137_v28 }
  0xc0   :  { %v116_v54 = vadd.f32 0.4994258, %v115_v50  ;;  %v105_v63 = vadd.f32 0.18741608, %v104_v59  ;;  %v145_v0 = vadd.f32 0.18741608, %v144_v62 }
  0xc1   :  { %v156_v55 = vadd.f32 0.4994258, %v155_v52 }
  0xc2   :  { %v117_v56 = vmul.f32 %v116_v54, %v97_v27  ;;  %v106_v2 = vmul.f32 %v105_v63, %v97_v27  ;;  %v146_v5 = vmul.f32 %v145_v0, %v137_v28 }
  0xc3   :  { %v157_v58 = vmul.f32 %v156_v55, %v137_v28 }
  0xc4   :  { %v118_v60 = vadd.f32 1.0, %v117_v56  ;;  %v107_v8 = vadd.f32 1.1283791, %v106_v2  ;;  %v147_v14 = vadd.f32 1.1283791, %v146_v5 }
  0xc5   :  { %v158_v61 = vadd.f32 1.0, %v157_v58 }
  0xc6   :  { %226 = vrcp.f32 %v118_v60  ;;  %v130_v9 = vand.u32 2147483648, %v118_v60  ;;  %v128_v12 = vand.u32 2147483647, %v118_v60  ;;  %vm124_vm2 = vweird.f32 %v118_v60 }
  0xc7   :  { %228 = vrcp.f32 %v158_v61  ;;  %v170_v13 = vand.u32 2147483648, %v158_v61  ;;  %v168_v16 = vand.u32 2147483647, %v158_v61  ;;  %vm164_vm4 = vweird.f32 %v158_v61 }
  0xc8   :  { %v131_v18 = vor.u32 1.1754944e-38, %v130_v9  ;;  %v108_v20 = vmul.f32 %v107_v8, %v353_v23  ;;  %vm129_vm5 = vcmp.eq.f32.partialorder %v128_v12, 8.507059e+37  ;;  %v148_v28 = vmul.f32 %v147_v14, %v356_v24 }
  0xc9   :  { %v171_v26 = vor.u32 1.1754944e-38, %v170_v13  ;;  %vm169_vm7 = vcmp.eq.f32.partialorder %v168_v16, 8.507059e+37  ;;  %v93_v23 = vmul.f32 0.5, %v350_v22 }
  0xcc   :  { %v227_v1 = vpop.eup %226 }
  0xcd   :  { %v229_v3 = vpop.eup %228  ;;  %v120_v4 = vmul.f32 %v227_v1, %v118_v60  ;;  %vm125_vm0 = vweird.f32 %v227_v1 }
  0xce   :  { %v160_v6 = vmul.f32 %v229_v3, %v158_v61  ;;  %vm165_vm1 = vweird.f32 %v229_v3  ;;  %vm126_vm3 = vmor %vm124_vm2, %vm125_vm0 }
  0xcf   :  { %v121_v7 = vsub.f32 1.0, %v120_v4  ;;  %vm166_vm6 = vmor %vm164_vm4, %vm165_vm1 }
  0xd0   :  { %v161_v10 = vsub.f32 1.0, %v160_v6 }
  0xd1   :  { %v122_v11 = vmul.f32 %v227_v1, %v121_v7 }
  0xd2   :  { %v162_v15 = vmul.f32 %v229_v3, %v161_v10 }
  0xd3   :  { %v123_v17 = vadd.f32 %v227_v1, %v122_v11 }
  0xd4   :  { %v163_v19 = vadd.f32 %v229_v3, %v162_v15 }
  0xd5   :  { %v127_v25 = vsel %vm126_vm3, %v227_v1, %v123_v17 }
  0xd6   :  { %v132_v27 = vsel %vm129_vm5, %v131_v18, %v127_v25  ;;  %v167_v29 = vsel %vm166_vm6, %v229_v3, %v163_v19 }
  0xd7   :  { %v133_v30 = vmul.f32 %v132_v27, %v108_v20  ;;  %v172_v31 = vsel %vm169_vm7, %v171_v26, %v167_v29 }
  0xd8   :  { %v173_v32 = vmul.f32 %v172_v31, %v148_v28 }
  0xd9   :  { %v202_v33 = vclamps-f32 %v133_v30, 1.0 }
  0xda   :  { %v203_v34 = vclamps-f32 %v173_v32, 1.0 }
  0xdb   :  { %v176_v36 = vadd.f32 1.0, %v202_v33 }
  0xdc   :  { %v177_v37 = vadd.f32 1.0, %v203_v34 }
  0xdd   :  { %v178_v24 = vmul.f32 %v176_v36, %v92_v35 }
  0xde   :  { %v179_v38 = vmul.f32 %v177_v37, %v93_v23 }
  0xdf   :  { %180 = vst [vmem:[#allocation7] sm:$0xff] %v178_v24 }
  0xe0   :  { %181 = vst [vmem:[#allocation7 + $0x8] sm:$0xff] %v179_v38 }
  0xe1   :  { %194 = dma.vmem_to_hbm [thread:$0]  %s187_s24, 256, %s189_s27, [#allocation4], %s309_s20, %s309_s20, %s310_s21  }
  0xe2   :  { %306 = dma.done.wait [#allocation4], 256  }
  0xe3   :  { %307 = vsyncadd [#allocation4], 4294967040 }
  0xe4   :  { %199 = vsyncpa [#allocation3], 1 }
  0xe5   :  { %200 = vsyncpa [#allocation6], 1 }
  0xe6   :  { %201 = vsyncpa [#allocation4], 1 }

</bundles_post_ra>
